<compile_context>
chip_gen: v5e
topology: v5e:2x2
jax: 0.10.0
libtpu: 0.0.40
codegen_flags: <defaults>
</compile_context>

<pallas_src>
import jax
import jax.numpy as jnp
import numpy as np
from jax import lax
from jax.experimental import pallas as pl
from jax.experimental.pallas import tpu as pltpu

# Fixed, non-trainable "parameters" from the module's __init__.
KERNEL_X = np.array([[-1.0, 0.0, 1.0],
                     [-2.0, 0.0, 2.0],
                     [-1.0, 0.0, 1.0]], dtype=np.float32)
KERNEL_Y = np.array([[1.0, 2.0, 1.0],
                     [0.0, 0.0, 0.0],
                     [-1.0, -2.0, -1.0]], dtype=np.float32)


def _row_filters(x):
    """Horizontal (separable) Sobel row passes for x of shape (R, W), float32.

    Returns:
      h1 = right - left           (x-derivative row pass)
      h2 = left + 2*x + right     (smoothing row pass)
    where left/right neighbours outside the image are zero (conv padding=1).
    """
    R, W = x.shape
    if W % 128 == 0:
        # Lane-aligned width: XLU rotates + mask of the wrapped-around column.
        col = lax.broadcasted_iota(jnp.int32, (R, W), 1)
        left = jnp.where(col == 0, 0.0, pltpu.roll(x, shift=1, axis=1))
        right = jnp.where(col == W - 1, 0.0, pltpu.roll(x, shift=W - 1, axis=1))
    else:
        # Small / unaligned W: explicit zero column + static slices.
        zcol = jnp.zeros((R, 1), x.dtype)
        left = jnp.concatenate([zcol, x[:, :-1]], axis=1)
        right = jnp.concatenate([x[:, 1:], zcol], axis=1)
    h1 = right - left
    h2 = left + 2.0 * x + right
    return h1, h2


def sobelxy_kernel(x_ref, top_ref, bot_ref, o_ref):
    """One (tile_h, W) row strip of one batch plane.

    x_ref:   (tile_h, W)  current strip
    top_ref: (halo, W)    halo block ending just above the strip (clamped at image top)
    bot_ref: (halo, W)    halo block starting just below the strip (clamped at bottom)
    o_ref:   (tile_h, W)  output strip
    """
    i = pl.program_id(1)
    last = pl.num_programs(1) - 1
    halo = top_ref.shape[0]

    x = x_ref[...].astype(jnp.float32)

    # Image row directly above / below this strip; zero at the image border (padding=1).
    top_row = top_ref[halo - 1:halo, :].astype(jnp.float32)
    bot_row = bot_ref[0:1, :].astype(jnp.float32)
    top_row = jnp.where(i == 0, 0.0, top_row)
    bot_row = jnp.where(i == last, 0.0, bot_row)

    # Separable horizontal passes.
    h1, h2 = _row_filters(x)
    h1_t, h2_t = _row_filters(top_row)
    h1_b, h2_b = _row_filters(bot_row)

    # Vertical combination via row offsets, stitching in the halo rows.
    h1_up = jnp.concatenate([h1_t, h1[:-1, :]], axis=0)   # h1 at row r-1
    h1_dn = jnp.concatenate([h1[1:, :], h1_b], axis=0)    # h1 at row r+1
    h2_up = jnp.concatenate([h2_t, h2[:-1, :]], axis=0)
    h2_dn = jnp.concatenate([h2[1:, :], h2_b], axis=0)

    gx = h1_up + 2.0 * h1 + h1_dn
    gy = h2_up - h2_dn
    o_ref[...] = (jnp.abs(gx) + jnp.abs(gy)).astype(o_ref.dtype)


def _pick_tile_h(H, W, itemsize):
    """Largest strip height that divides H, is a multiple of 8, keeps the
    double-buffered working set ~<=10 MiB, and is <= 256 rows (so there are
    several grid steps for pipelining / megacore sharding)."""
    if H % 8 != 0:
        # TODO(synk): heights not divisible by 8 fall back to one full-plane strip.
        return H
    budget = 10 * 1024 * 1024
    best = 8
    t = 8
    while t <= min(H, 256):
        if H % t == 0 and 2 * (2 * t + 16) * W * itemsize <= budget:
            best = t
        t += 8
    return best


def sobelxy(x, *, tile_h=None):
    """x: (N, 1, H, W) -> (N, 1, H, W) = |conv2d(x, Kx, pad=1)| + |conv2d(x, Ky, pad=1)|."""
    N, C, H, W = x.shape
    if C != 1:
        raise ValueError("Sobelxy's conv weight is (1, 1, 3, 3); input must have C == 1.")

    x3 = x.reshape(N, H, W)
    itemsize = jnp.dtype(x.dtype).itemsize

    if tile_h is None:
        tile_h = _pick_tile_h(H, W, itemsize)
    if H % tile_h != 0 or not (tile_h == H or tile_h % 8 == 0):
        raise ValueError(f"tile_h={tile_h} must divide H={H} and be a multiple of 8 (or == H).")

    num_strips = H // tile_h
    halo = 8 if H >= 8 else H               # halo block height (8-row aligned blocks)
    rpb = max(tile_h // halo, 1)            # halo-sized blocks per strip
    max_halo_blk = (H - halo) // halo       # last fully in-bounds halo block index

    grid_spec = pltpu.PrefetchScalarGridSpec(
        num_scalar_prefetch=0,
        grid=(N, num_strips),
        in_specs=[
            # Current strip (lane-dense, full width).
            pl.BlockSpec((pl.Squeezed(), tile_h, W), lambda n, i: (n, i, 0)),
            # Halo block ending just above the strip (clamped; masked in-kernel at i==0).
            pl.BlockSpec((pl.Squeezed(), halo, W),
                         lambda n, i: (n, jnp.maximum(i * rpb - 1, 0), 0)),
            # Halo block starting just below the strip (clamped; masked at i==last).
            pl.BlockSpec((pl.Squeezed(), halo, W),
                         lambda n, i: (n, jnp.minimum((i + 1) * rpb, max_halo_blk), 0)),
        ],
        out_specs=pl.BlockSpec((pl.Squeezed(), tile_h, W), lambda n, i: (n, i, 0)),
    )

    out = pl.pallas_call(
        sobelxy_kernel,
        out_shape=jax.ShapeDtypeStruct((N, H, W), x.dtype),
        grid_spec=grid_spec,
        compiler_params=pltpu.CompilerParams(
            dimension_semantics=("parallel", "parallel")),
    )(x3, x3, x3)  # same array passed 3x: strip view + top halo view + bottom halo view
    return out.reshape(N, C, H, W)


def _reference(x):
    """Pure-JAX reference: F.conv2d(x, w, padding=1) with the two Sobel kernels."""
    wx = jnp.asarray(KERNEL_X).reshape(1, 1, 3, 3)
    wy = jnp.asarray(KERNEL_Y).reshape(1, 1, 3, 3)
    dn = lax.conv_dimension_numbers(x.shape, wx.shape, ("NCHW", "OIHW", "NCHW"))
    sx = lax.conv_general_dilated(x, wx, (1, 1), ((1, 1), (1, 1)), dimension_numbers=dn)
    sy = lax.conv_general_dilated(x, wy, (1, 1), ((1, 1), (1, 1)), dimension_numbers=dn)
    return jnp.abs(sx) + jnp.abs(sy)


if __name__ == "__main__":
    key = jax.random.PRNGKey(0)
    cases = [
        # (shape, tile_h override)
        ((2, 1, 16, 128), None),  # lane-dense W, auto tile (single strip)
        ((2, 1, 16, 128), 8),     # forced 2 row strips -> exercises halo stitching
        ((2, 1, 16, 16), None),   # small-W fallback path (spatial=16)
    ]
    for idx, (shape, th) in enumerate(cases):
        xk = jax.random.fold_in(key, idx)
        x = jax.random.normal(xk, shape, dtype=jnp.float32)
        out = jax.block_until_ready(sobelxy(x, tile_h=th))
        ref = jax.block_until_ready(_reference(x))
        np.testing.assert_allclose(np.asarray(out), np.asarray(ref), rtol=1e-5, atol=1e-5)
    print("KERNEL_OK")
</pallas_src>

<mosaic_0001>
module attributes {stable_mosaic.version = 11 : i64} {
  func.func @sobelxy_kernel(%arg0: i32, %arg1: i32, %arg2: memref<1x16x128xf32, #tpu.memory_space<vmem>>, %arg3: memref<1x8x128xf32, #tpu.memory_space<vmem>>, %arg4: memref<1x8x128xf32, #tpu.memory_space<vmem>>, %arg5: memref<1x16x128xf32, #tpu.memory_space<vmem>>) attributes {dimension_semantics = [#tpu.dimension_semantics<parallel>, #tpu.dimension_semantics<parallel>], iteration_bounds = array<i64: 2, 1>, scalar_prefetch = 0 : i64, scratch_operands = 0 : i64, tpu.core_type = #tpu.core_type<tc>, window_params = [{transform_indices = @transform_0, window_bounds = array<i64: 1, 16, 128>}, {transform_indices = @transform_1, window_bounds = array<i64: 1, 8, 128>}, {transform_indices = @transform_2, window_bounds = array<i64: 1, 8, 128>}, {transform_indices = @transform_3, window_bounds = array<i64: 1, 16, 128>}]} {
    %c0 = arith.constant 0 : index
    %c0_0 = arith.constant 0 : index
    %c0_1 = arith.constant 0 : index
    %0 = vector.load %arg2[%c0, %c0_0, %c0_1] : memref<1x16x128xf32, #tpu.memory_space<vmem>>, vector<1x16x128xf32>
    %1 = vector.shape_cast %0 : vector<1x16x128xf32> to vector<16x128xf32>
    %c0_2 = arith.constant 0 : index
    %c7 = arith.constant 7 : index
    %c0_3 = arith.constant 0 : index
    %2 = vector.load %arg3[%c0_2, %c7, %c0_3] : memref<1x8x128xf32, #tpu.memory_space<vmem>>, vector<1x1x128xf32>
    %3 = vector.shape_cast %2 : vector<1x1x128xf32> to vector<1x128xf32>
    %c0_4 = arith.constant 0 : index
    %c0_5 = arith.constant 0 : index
    %c0_6 = arith.constant 0 : index
    %4 = vector.load %arg4[%c0_4, %c0_5, %c0_6] : memref<1x8x128xf32, #tpu.memory_space<vmem>>, vector<1x1x128xf32>
    %5 = vector.shape_cast %4 : vector<1x1x128xf32> to vector<1x128xf32>
    %c0_i32 = arith.constant 0 : i32
    %6 = arith.cmpi eq, %arg1, %c0_i32 : i32
    %cst = arith.constant 0.000000e+00 : f32
    %7 = vector.broadcast %cst : f32 to vector<1x128xf32>
    %8 = arith.select %6, %7, %3 : vector<1x128xf32>
    %c0_i32_7 = arith.constant 0 : i32
    %9 = arith.cmpi eq, %arg1, %c0_i32_7 : i32
    %cst_8 = arith.constant 0.000000e+00 : f32
    %10 = vector.broadcast %cst_8 : f32 to vector<1x128xf32>
    %11 = arith.select %9, %10, %5 : vector<1x128xf32>
    %12 = tpu.iota {dimensions = array<i32: 1>} : vector<16x128xi32>
    %c0_i32_9 = arith.constant 0 : i32
    %13 = vector.broadcast %c0_i32_9 : i32 to vector<16x128xi32>
    %14 = arith.cmpi eq, %12, %13 : vector<16x128xi32>
    %c1_i32 = arith.constant 1 : i32
    %15 = tpu.dynamic_rotate %1 by %c1_i32 dim 1 : vector<16x128xf32>, i32 -> vector<16x128xf32>
    %cst_10 = arith.constant 0.000000e+00 : f32
    %16 = vector.broadcast %cst_10 : f32 to vector<16x128xf32>
    %17 = arith.select %14, %16, %15 : vector<16x128xi1>, vector<16x128xf32>
    %c127_i32 = arith.constant 127 : i32
    %18 = vector.broadcast %c127_i32 : i32 to vector<16x128xi32>
    %19 = arith.cmpi eq, %12, %18 : vector<16x128xi32>
    %c127_i32_11 = arith.constant 127 : i32
    %20 = tpu.dynamic_rotate %1 by %c127_i32_11 dim 1 : vector<16x128xf32>, i32 -> vector<16x128xf32>
    %cst_12 = arith.constant 0.000000e+00 : f32
    %21 = vector.broadcast %cst_12 : f32 to vector<16x128xf32>
    %22 = arith.select %19, %21, %20 : vector<16x128xi1>, vector<16x128xf32>
    %23 = arith.subf %22, %17 : vector<16x128xf32>
    %cst_13 = arith.constant 2.000000e+00 : f32
    %24 = vector.broadcast %cst_13 : f32 to vector<16x128xf32>
    %25 = arith.mulf %24, %1 : vector<16x128xf32>
    %26 = arith.addf %17, %25 : vector<16x128xf32>
    %27 = arith.addf %26, %22 : vector<16x128xf32>
    %28 = tpu.iota {dimensions = array<i32: 1>} : vector<1x128xi32>
    %c0_i32_14 = arith.constant 0 : i32
    %29 = vector.broadcast %c0_i32_14 : i32 to vector<1x128xi32>
    %30 = arith.cmpi eq, %28, %29 : vector<1x128xi32>
    %c1_i32_15 = arith.constant 1 : i32
    %31 = tpu.dynamic_rotate %8 by %c1_i32_15 dim 1 : vector<1x128xf32>, i32 -> vector<1x128xf32>
    %cst_16 = arith.constant 0.000000e+00 : f32
    %32 = vector.broadcast %cst_16 : f32 to vector<1x128xf32>
    %33 = arith.select %30, %32, %31 : vector<1x128xi1>, vector<1x128xf32>
    %c127_i32_17 = arith.constant 127 : i32
    %34 = vector.broadcast %c127_i32_17 : i32 to vector<1x128xi32>
    %35 = arith.cmpi eq, %28, %34 : vector<1x128xi32>
    %c127_i32_18 = arith.constant 127 : i32
    %36 = tpu.dynamic_rotate %8 by %c127_i32_18 dim 1 : vector<1x128xf32>, i32 -> vector<1x128xf32>
    %cst_19 = arith.constant 0.000000e+00 : f32
    %37 = vector.broadcast %cst_19 : f32 to vector<1x128xf32>
    %38 = arith.select %35, %37, %36 : vector<1x128xi1>, vector<1x128xf32>
    %39 = arith.subf %38, %33 : vector<1x128xf32>
    %cst_20 = arith.constant 2.000000e+00 : f32
    %40 = vector.broadcast %cst_20 : f32 to vector<1x128xf32>
    %41 = arith.mulf %40, %8 : vector<1x128xf32>
    %42 = arith.addf %33, %41 : vector<1x128xf32>
    %43 = arith.addf %42, %38 : vector<1x128xf32>
    %44 = tpu.iota {dimensions = array<i32: 1>} : vector<1x128xi32>
    %c0_i32_21 = arith.constant 0 : i32
    %45 = vector.broadcast %c0_i32_21 : i32 to vector<1x128xi32>
    %46 = arith.cmpi eq, %44, %45 : vector<1x128xi32>
    %c1_i32_22 = arith.constant 1 : i32
    %47 = tpu.dynamic_rotate %11 by %c1_i32_22 dim 1 : vector<1x128xf32>, i32 -> vector<1x128xf32>
    %cst_23 = arith.constant 0.000000e+00 : f32
    %48 = vector.broadcast %cst_23 : f32 to vector<1x128xf32>
    %49 = arith.select %46, %48, %47 : vector<1x128xi1>, vector<1x128xf32>
    %c127_i32_24 = arith.constant 127 : i32
    %50 = vector.broadcast %c127_i32_24 : i32 to vector<1x128xi32>
    %51 = arith.cmpi eq, %44, %50 : vector<1x128xi32>
    %c127_i32_25 = arith.constant 127 : i32
    %52 = tpu.dynamic_rotate %11 by %c127_i32_25 dim 1 : vector<1x128xf32>, i32 -> vector<1x128xf32>
    %cst_26 = arith.constant 0.000000e+00 : f32
    %53 = vector.broadcast %cst_26 : f32 to vector<1x128xf32>
    %54 = arith.select %51, %53, %52 : vector<1x128xi1>, vector<1x128xf32>
    %55 = arith.subf %54, %49 : vector<1x128xf32>
    %cst_27 = arith.constant 2.000000e+00 : f32
    %56 = vector.broadcast %cst_27 : f32 to vector<1x128xf32>
    %57 = arith.mulf %56, %11 : vector<1x128xf32>
    %58 = arith.addf %49, %57 : vector<1x128xf32>
    %59 = arith.addf %58, %54 : vector<1x128xf32>
    %60 = vector.extract_strided_slice %23 {offsets = [0, 0], sizes = [15, 128], strides = [1, 1]} : vector<16x128xf32> to vector<15x128xf32>
    %61 = tpu.concatenate %39, %60 in 0 : vector<1x128xf32>, vector<15x128xf32> -> vector<16x128xf32>
    %62 = vector.extract_strided_slice %23 {offsets = [1, 0], sizes = [15, 128], strides = [1, 1]} : vector<16x128xf32> to vector<15x128xf32>
    %63 = tpu.concatenate %62, %55 in 0 : vector<15x128xf32>, vector<1x128xf32> -> vector<16x128xf32>
    %64 = vector.extract_strided_slice %27 {offsets = [0, 0], sizes = [15, 128], strides = [1, 1]} : vector<16x128xf32> to vector<15x128xf32>
    %65 = tpu.concatenate %43, %64 in 0 : vector<1x128xf32>, vector<15x128xf32> -> vector<16x128xf32>
    %66 = vector.extract_strided_slice %27 {offsets = [1, 0], sizes = [15, 128], strides = [1, 1]} : vector<16x128xf32> to vector<15x128xf32>
    %67 = tpu.concatenate %66, %59 in 0 : vector<15x128xf32>, vector<1x128xf32> -> vector<16x128xf32>
    %cst_28 = arith.constant 2.000000e+00 : f32
    %68 = vector.broadcast %cst_28 : f32 to vector<16x128xf32>
    %69 = arith.mulf %68, %23 : vector<16x128xf32>
    %70 = arith.addf %61, %69 : vector<16x128xf32>
    %71 = arith.addf %70, %63 : vector<16x128xf32>
    %72 = arith.subf %65, %67 : vector<16x128xf32>
    %73 = math.absf %71 : vector<16x128xf32>
    %74 = math.absf %72 : vector<16x128xf32>
    %75 = arith.addf %73, %74 : vector<16x128xf32>
    %c0_29 = arith.constant 0 : index
    %c0_30 = arith.constant 0 : index
    %c0_31 = arith.constant 0 : index
    %76 = vector.load %arg5[%c0_29, %c0_30, %c0_31] : memref<1x16x128xf32, #tpu.memory_space<vmem>>, vector<1x16x128xf32>
    %77 = vector.shape_cast %76 : vector<1x16x128xf32> to vector<16x128xf32>
    %78 = vector.shape_cast %75 : vector<16x128xf32> to vector<1x16x128xf32>
    tpu.vector_store %arg5[%c0_29, %c0_30, %c0_31], %78 {strides = array<i32>} : memref<1x16x128xf32, #tpu.memory_space<vmem>>, vector<1x16x128xf32>,
    return
  }
  func.func @transform_0(%arg0: i32, %arg1: i32) -> (i32, i32, i32) {
    %c0_i32 = arith.constant 0 : i32
    %c0_i32_0 = arith.constant 0 : i32
    return %arg0, %arg1, %c0_i32 : i32, i32, i32
  }
  func.func @transform_1(%arg0: i32, %arg1: i32) -> (i32, i32, i32) {
    %c2_i32 = arith.constant 2 : i32
    %0 = arith.muli %arg1, %c2_i32 : i32
    %c1_i32 = arith.constant 1 : i32
    %1 = arith.subi %0, %c1_i32 : i32
    %c0_i32 = arith.constant 0 : i32
    %2 = arith.maxsi %1, %c0_i32 : i32
    %c0_i32_0 = arith.constant 0 : i32
    %c0_i32_1 = arith.constant 0 : i32
    return %arg0, %2, %c0_i32_0 : i32, i32, i32
  }
  func.func @transform_2(%arg0: i32, %arg1: i32) -> (i32, i32, i32) {
    %c1_i32 = arith.constant 1 : i32
    %0 = arith.addi %arg1, %c1_i32 : i32
    %c2_i32 = arith.constant 2 : i32
    %1 = arith.muli %0, %c2_i32 : i32
    %c1_i32_0 = arith.constant 1 : i32
    %2 = arith.minsi %1, %c1_i32_0 : i32
    %c0_i32 = arith.constant 0 : i32
    %c0_i32_1 = arith.constant 0 : i32
    return %arg0, %2, %c0_i32 : i32, i32, i32
  }
  func.func @transform_3(%arg0: i32, %arg1: i32) -> (i32, i32, i32) {
    %c0_i32 = arith.constant 0 : i32
    %c0_i32_0 = arith.constant 0 : i32
    return %arg0, %arg1, %c0_i32 : i32, i32, i32
  }
}

</mosaic_0001>

<bundles_post_ra>
// kernel: tpu_custom_call.1
= control target key start
LH: loop header
LB: loop body
LE: loop exit
PB: predicated region body
PF: predicated region fallthrough
CT: control target
= control target key end

     0   :  { %s1089_s0 = inlined_call_operand.hbm [shape: f32[2,16,128], index: 0, kind: input, shape index: {}]   ;;  %s1090_s1 = inlined_call_operand.hbm [shape: f32[2,16,128], index: 1, kind: input, shape index: {}]   ;;  %s1091_s2 = inlined_call_operand.hbm [shape: f32[2,16,128], index: 2, kind: input, shape index: {}]   ;;  %s1092_s3 = inlined_call_operand.hbm [shape: f32[2,16,128], index: 3, kind: output, shape index: {}]  }
   0x1   :  { %1096 = sst [smem:[#allocation16_spill]] %s1089_s0 }
   0x2   :  { %1097 = sst [smem:[#allocation17_spill]] %s1090_s1 }
   0x3   :  { %8 = vsyncpa [#allocation3], 0 }
   0x4   :  { %10 = vsyncpa [#allocation3 + $0x1], 0 }
   0x5   :  { %11 = vsyncpa [#allocation6], 0 }
   0x6   :  { %13 = vsyncpa [#allocation6 + $0x1], 0 }
   0x7   :  { %14 = vsyncpa [#allocation4], 0 }
   0x8   :  { %16 = vsyncpa [#allocation4 + $0x1], 0  ;;  %s907_s12 = smov 0   ;;  %s909_s13 = smov 0  }
   0x9   :  { %s911_s14 = smov 0   ;;  %s913_s15 = smov 0  }
   0xa   :  { %s915_s16 = smov 0   ;;  %s917_s17 = smov 0  }
   0xb LB: > { %1098 = sst [smem:[#allocation12_spill]] %s866_s14  ;;  %s938_s18 = sadd.s32 4294967295, %s878_s17   ;;  %s878_s17 = sphi %s917_s17, %s22_s17   ;;  %s874_s16 = sphi %s915_s16, %s1116_s16   ;;  %s870_s15 = sphi %s913_s15, %s1112_s15   ;;  %s866_s14 = sphi %s911_s14, %s1111_s14   ;;  %s862_s13 = sphi %s909_s13, %s1115_s13   ;;  %s858_s12 = sphi %s907_s12, %s1114_s12  }
   0xc   : > { %1099 = sst [smem:[#allocation13_spill]] %s874_s16  ;;  %s585_s19 = sadd.s32 4294967294, %s878_s17  }
   0xd   : > { %s34_s20 = sadd.s32 1, %s874_s16  ;;  %s43_s21 = sadd.s32 1, %s866_s14 }
   0xe   : > { %p36_p0 = scmp.ge.s32.totalorder %s34_s20, 2  ;;  %p50_p1 = scmp.ne.s32.totalorder %s866_s14, %s862_s13 }
   0xf   : > { %p51_p2 = scmp.eq.s32.totalorder %s878_s17, 0  ;;  %p56_p3 = scmp.ne.s32.totalorder %s862_s13, %s858_s12 }
  0x10   : > { %s1118_s20 = smov (%p36_p0, %s34_s20), 0  ;;  %p57_p5 = scmp.eq.s32.totalorder %s938_s18, 0 }
  0x11   : > { %1100 = sst [smem:[#allocation14_spill]] %s1118_s20  ;;  %p950_p4 = por %p51_p2, %p50_p1 }
  0x12   : > { %s38_s23 = ssub.s32 %s874_s16, %s1118_s20  ;;  %p154_p6 = scmp.eq.s32.totalorder %s938_s18, 1 }
  0x13   : > { %p41_p7 = scmp.eq.s32.totalorder %s38_s23, 0  ;;  %p958_p8 = por %p57_p5, %p56_p3 }
  0x14   : > { %p962_p9 = por %p154_p6, %p50_p1  ;;  %p160_p10 = scmp.eq.s32.totalorder %s585_s19, 1 }
  0x15   : > { %s967_s26 = scalar_select %p41_p7, %s866_s14, %s43_s21  }
  0x16   : > { %p969_p11 = por %p160_p10, %p56_p3  ;;  %p587_p12 = scmp.ge.s32.totalorder %s878_s17, 2 }
  0x17   : > { %1104 = sst [smem:[#allocation15_spill]] %s967_s26  ;;  %p635_p13 = scmp.lt.s32.totalorder %s878_s17, 2 }
  0x18   : > { %s976_s28 = sand.u32 1, %s866_s14   ;;  %s979_s29 = sshll.u32 %s874_s16, 4 }
  0x19   : > { %s204_s30 = sand.u32 1, %s878_s17   ;;  %s1106_s0 = sld [smem:[#allocation16_spill]] }
  0x1a   : > { %p988_p0 = pnand %p635_p13, %p950_p4  ;;  %s591_s8 = sshll.u32 %s976_s28, 3 }
  0x1b   : > { %s1108_s1 = sld [smem:[#allocation17_spill]]  ;;  %s208_s19 = scalar_lea.vmem [#allocation5], %s591_s8 }
  0x1c   : > { %s222_s21 = sshll.u32 %s208_s19, 4  ;;  %s205_s4 = scalar_lea.sflag [#allocation6], %s204_s30  ;;  %s223_s21 = int_to_ptr.vmem [resolvable:$true] %s222_s21 }
  0x1d   : > { %p597_p1 = scmp.ge.s32.totalorder %s878_s17, 1  ;;  %p252_p2 = scmp.lt.s32.totalorder %s878_s17, 3 }
  0x1e   : > { %s588_s5 = sshll.u32 %s976_s28, 4  ;;  %s610_s30 = sadd.s32 8, %s979_s29 }
  0x1f   : > { %s191_s6 = scalar_lea.hbm %s1106_s0, %s979_s29  ;;  %p1001_p3 = pnand %p597_p1, %p252_p2 }
  0x20   : > { %s192_s9 = sshll.u32 %s191_s6, 4  ;;  %s184_s10 = scalar_lea.vmem [#allocation2], %s588_s5  ;;  %s193_s9 = int_to_ptr.hbm [resolvable:$true] %s192_s9 }
  0x21   : > { %s218_s11 = scalar_lea.hbm %s1108_s1, %s979_s29  ;;  %s194_s19 = sshll.u32 %s184_s10, 4  ;;  %s195_s19 = int_to_ptr.vmem [resolvable:$true] %s194_s19 }
  0x22   : > { %s220_s23 = sshll.u32 %s218_s11, 4  ;;  %s181_s11 = scalar_lea.sflag [#allocation3], %s976_s28  ;;  %s221_s23 = int_to_ptr.hbm [resolvable:$true] %s220_s23 }
  0x23   : > { %627 = dma.hbm_to_vmem [thread:$0]  (!%p988_p0), %s221_s23, 128, %s223_s21, %s205_s4  }
  0x24   : > { %s880_s0 = smov 128   ;;  %s881_s1 = smov 8  }
  0x25   : > { %624 = dma.hbm_to_vmem [thread:$0]  (!%p988_p0), %s193_s9, 256, %s195_s19, %s181_s11, %s880_s0, %s880_s0, %s881_s1  }
  0x26   : > { %s233_s21 = scalar_lea.vmem [#allocation7], %s591_s8  ;;  %s243_s26 = scalar_lea.hbm %s1091_s2, %s610_s30 }
  0x27   : > { %s247_s23 = sshll.u32 %s233_s21, 4  ;;  %s245_s14 = sshll.u32 %s243_s26, 4  ;;  %s248_s23 = int_to_ptr.vmem [resolvable:$true] %s247_s23  ;;  %s246_s14 = int_to_ptr.hbm [resolvable:$true] %s245_s14 }
  0x28   : > { %630 = dma.hbm_to_vmem [thread:$0]  (!%p988_p0), %s246_s14, 128, %s248_s23, %s205_s4  }
  0x29   : > { %256 = sbr.rel (%p1001_p3) target bundleno = 194 (0xc2), region = 32  ;;  %s1018_s28 = sand.u32 (!%p1001_p3), 1, %s862_s13  }
  0x2a   : > { %s598_s0 = sshll.u32 (!%p1001_p3), %s1018_s28, 4  ;;  %s259_s1 = scalar_lea.sflag (!%p1001_p3), [#allocation3], %s1018_s28 }
  0x2b   : > { %s262_s16 = scalar_lea.vmem (!%p1001_p3), [#allocation2], %s598_s0 }
  0x2e   : > { %845 = dma.done.wait (%p958_p8), %s259_s1, 256  }
  0x2f   : > { %847 = vsyncadd (%p958_p8), %s259_s1, 4294967040  ;;  %s268_s14 = sand.u32 1, %s938_s18  }
  0x30   : > { %s269_s20 = scalar_lea.sflag [#allocation6], %s268_s14 }
  0x31   : > { %849 = dma.done.wait (%p958_p8), %s269_s20, 256  }
  0x32   : > { %851 = vsyncadd (%p958_p8), %s269_s20, 4294967040  ;;  %v882_v0 = vmov 0.0   ;;  %s883_s26 = smov 1   ;;  %v326_v1 = vld [vmem:[%s262_s16] sm:$0xff]  ;;  %s884_s29 = smov 127   ;;  %v327_v2 = vld [vmem:[%s262_s16 + $0x8] sm:$0xff]  ;;  %v336_v4 = vlaneseq }
  0x33   : > { %693 = vrot.lane.b32.xlu2 %v882_v0, %s883_s26  ;;  %346 = vrot.lane.b32.xlu1 %v326_v1, %s884_s29  ;;  %v354_v13 = vmul.f32 2.0, %v326_v1  ;;  %v355_v22 = vmul.f32 2.0, %v327_v2  ;;  %vm382_vm2 = vcmask 1040384   ;;  %vm389_vm3 = vcmask 1046528   ;;  %s611_s18 = sshll.u32 %s870_s15, 4  ;;  %s315_s7 = scalar_lea.vmem [#allocation8], %s598_s0 }
  0x34   : > { %339 = vrot.lane.b32.xlu0 %v326_v1, %s883_s26  ;;  %v337_v5 = vand.u32 127, %v336_v4  ;;  %s446_s15 = scalar_lea.hbm %s1092_s3, %s611_s18  ;;  %s447_s8 = sshll.u32 %s315_s7, 4  ;;  %s448_s8 = int_to_ptr.vmem [resolvable:$true] %s447_s8 }
  0x35   : > { %s449_s4 = sshll.u32 %s446_s15, 4  ;;  %s433_s22 = scalar_lea.sflag [#allocation4], %s1018_s28  ;;  %s450_s4 = int_to_ptr.hbm [resolvable:$true] %s449_s4 }
  0x36   : > { %vm338_vm0 = vcmp.eq.s32.totalorder %v337_v5, 0  ;;  %vm345_vm1 = vcmp.eq.s32.totalorder %v337_v5, 127  ;;  %s806_s5 = sshra.s32 %s450_s4, 4  ;;  %s812_s11 = scalar_lea.hbm %s1092_s3, 32  ;;  %s807_s5 = int_to_ptr.hbm [resolvable:$true] %s806_s5 }
  0x37   : > { %s808_s9 = scalar_lea.hbm %s807_s5, 16  ;;  %p813_p7 = scmp.lt.s32.totalorder %s807_s5, %s1092_s3 }
  0x38   : > { %p809_p4 = scmp.ne.s32.totalorder %s807_s5, %s808_s9  ;;  %p814_p8 = scmp.lt.s32.totalorder %s812_s11, %s808_s9 }
  0x3a   : > { %p810_p5 = pnand %p809_p4, %p962_p9  ;;  %p815_p10 = por %p814_p8, %p813_p7 }
  0x3b   : > { %698 = vrot.lane.b32.xlu2 %v882_v0, %s884_s29  ;;  %348 = vrot.lane.b32.xlu1 %v327_v2, %s884_s29 }
  0x3c   : > { %341 = vrot.lane.b32.xlu0 %v327_v2, %s883_s26  ;;  %p811_p6 = pneg %p810_p5 }
  0x3e   : > { %p816_p13 = pnand %p815_p10, %p811_p6 }
  0x8d   : > { %v694_v3 = vpop.permute.xlu2 %693 }
  0x8e   : > { %v695_v7 = vunpack.i.l.bf16 %v694_v3  ;;  %v696_v14 = vunpack.i.h.bf16 %v694_v3 }
  0x90   : > { %v362_v17 = vsel %vm338_vm0, 0.0, %v695_v7  ;;  %v372_v20 = vsel %vm338_vm0, 0.0, %v696_v14 }
  0x95   : > { %v699_v6 = vpop.permute.xlu2 %698 }
  0x96   : > { %v700_v8 = vunpack.i.l.bf16 %v699_v6  ;;  %v701_v15 = vunpack.i.h.bf16 %v699_v6 }
  0x98   : > { %v365_v18 = vsel %vm345_vm1, 0.0, %v700_v8  ;;  %v375_v21 = vsel %vm345_vm1, 0.0, %v701_v15 }
  0x99   : > { %v366_v23 = vsub.f32 %v365_v18, %v362_v17  ;;  %v376_v27 = vsub.f32 %v375_v21, %v372_v20  ;;  %v379_v34 = vadd.f32 %v375_v21, %v372_v20  ;;  %v369_v41 = vadd.f32 %v365_v18, %v362_v17 }
  0x9b   : > { %v396_v42 = vrot.slane %v376_v27, 1  ;;  %v413_v48 = vrot.slane %v379_v34, 1 }
  0xa5   : > { %v347_v9 = vpop.permute.xlu1 %346 }
  0xa6   : > { %v340_v10 = vpop.permute.xlu0 %339  ;;  %v350_v11 = vsel %vm345_vm1, 0.0, %v347_v9 }
  0xa7   : > { %v343_v12 = vsel %vm338_vm0, 0.0, %v340_v10 }
  0xa8   : > { %v352_v16 = vsub.f32 %v350_v11, %v343_v12  ;;  %v356_v19 = vadd.f32 %v354_v13, %v343_v12 }
  0xaa   : > { %v383_v24 = vrot.slane %v352_v16, 7  ;;  %v358_v28 = vadd.f32 %v356_v19, %v350_v11  ;;  %v416_v31 = vmul.f32 2.0, %v352_v16  ;;  %v390_v36 = vrot.slane %v352_v16, 1 }
  0xac   : > { %v388_v35 = vsel %vm382_vm2, %v366_v23, %v383_v24  ;;  %v401_v43 = vrot.slane %v358_v28, 7  ;;  %v407_v49 = vrot.slane %v358_v28, 1 }
  0xad   : > { %v349_v25 = vpop.permute.xlu1 %348  ;;  %v418_v44 = vadd.f32 %v416_v31, %v388_v35 }
  0xae   : > { %v342_v26 = vpop.permute.xlu0 %341  ;;  %v351_v29 = vsel %vm345_vm1, 0.0, %v349_v25  ;;  %v406_v55 = vsel %vm382_vm2, %v369_v41, %v401_v43 }
  0xaf   : > { %v344_v30 = vsel %vm338_vm0, 0.0, %v342_v26 }
  0xb0   : > { %v353_v32 = vsub.f32 %v351_v29, %v344_v30  ;;  %v357_v33 = vadd.f32 %v355_v22, %v344_v30 }
  0xb2   : > { %v359_v37 = vadd.f32 %v357_v33, %v351_v29  ;;  %v384_v38 = vrot.slane %v353_v32, 7  ;;  %v391_v39 = vrot.slane %v353_v32, 1  ;;  %v417_v40 = vmul.f32 2.0, %v353_v32 }
  0xb4   : > { %v385_v45 = vsel %vm382_vm2, %v383_v24, %v384_v38  ;;  %v392_v46 = vsel %vm389_vm3, %v390_v36, %v391_v39  ;;  %v402_v47 = vrot.slane %v359_v37, 7  ;;  %v408_v50 = vrot.slane %v359_v37, 1 }
  0xb5   : > { %v419_v51 = vadd.f32 %v417_v40, %v385_v45  ;;  %v398_v52 = vsel %vm389_vm3, %v391_v39, %v396_v42  ;;  %v420_v54 = vadd.f32 %v418_v44, %v392_v46 }
  0xb6   : > { %v403_v53 = vsel %vm382_vm2, %v401_v43, %v402_v47  ;;  %v409_v56 = vsel %vm389_vm3, %v407_v49, %v408_v50  ;;  %v415_v57 = vsel %vm389_vm3, %v408_v50, %v413_v48 }
  0xb7   : > { %v421_v58 = vadd.f32 %v419_v51, %v398_v52  ;;  %v422_v59 = vsub.f32 %v406_v55, %v409_v56  ;;  %v423_v60 = vsub.f32 %v403_v53, %v415_v57  ;;  %v424_v62 = vand.u32 2147483647, %v420_v54 }
  0xb9   : > { %v425_v61 = vand.u32 2147483647, %v421_v58  ;;  %v426_v63 = vand.u32 2147483647, %v422_v59  ;;  %v427_v0 = vand.u32 2147483647, %v423_v60 }
  0xbb   : > { %v428_v1 = vadd.f32 %v426_v63, %v424_v62  ;;  %v429_v2 = vadd.f32 %v427_v0, %v425_v61 }
  0xbd   : > { %430 = vst [vmem:[%s315_s7] sm:$0xff] %v428_v1 }
  0xbe   : > { %431 = vst [vmem:[%s315_s7 + $0x8] sm:$0xff] %v429_v2 }
  0xbf   : > { %819 = shalt.err (!%p816_p13)
}
  0xc0   : > { %s885_s23 = smov 128   ;;  %s886_s28 = smov 8  }
  0xc1   : > { %619 = dma.vmem_to_hbm [thread:$0]  (%p962_p9), %s448_s8, 256, %s450_s4, %s433_s22, %s885_s23, %s885_s23, %s886_s28  }
  0xc2 PF: > { %s464_s0 = sand.u32 1, %s858_s12   ;;  %p632_p0 = pnand %p587_p12, %p969_p11 }
  0xc3   : > { %s465_s1 = scalar_lea.sflag [#allocation4], %s464_s0 }
  0xc4   : > { %p633_p1 = pneg %p632_p0 }
  0xc6   : > { %853 = dma.done.wait (%p633_p1), %s465_s1, 256  }
  0xc7   : > { %855 = vsyncadd (%p633_p1), %s465_s1, 4294967040  ;;  %s22_s17 = sadd.s32 1, %s878_s17   ;;  %s1110_s16 = sld [smem:[#allocation12_spill]] }
  0xc8   : > { %p19_p2 = scmp.ge.s32.totalorder %s22_s17, 4   ;;  %s1111_s14 = sld [smem:[#allocation15_spill]] }
  0xc9   : > { %s1112_s15 = sld [smem:[#allocation13_spill]]  ;;  %s1114_s12 = smov %s862_s13 }
  0xca   : > { %s1113_s25 = sld [smem:[#allocation14_spill]] }
  0xcc   :  { %21 = sbr.rel (!%p19_p2) target bundleno = 11 (0xb), region = 101 }
  0xcd   : > { %s1115_s13 = smov %s1110_s16 }
  0xd0   : > { %s1116_s16 = smov %s1113_s25 }
  0xd1   :  { %471 = vsyncpa [#allocation3], 1 }
  0xd2   :  { %473 = vsyncpa [#allocation3 + $0x1], 1 }
  0xd3   :  { %474 = vsyncpa [#allocation6], 1 }
  0xd4   :  { %476 = vsyncpa [#allocation6 + $0x1], 1 }
  0xd5   :  { %477 = vsyncpa [#allocation4], 1 }
  0xd6   :  { %479 = vsyncpa [#allocation4 + $0x1], 1 }

</bundles_post_ra>
